<compile_context>
chip_gen: v7x
topology: tpu7x:2x2x1
jax: 0.10.0
libtpu: 0.0.40
codegen_flags: <defaults>
</compile_context>

<pallas_src>
import functools

import jax
import jax.numpy as jnp
from jax.experimental import pallas as pl
from jax.experimental.pallas import tpu as pltpu

LANE = 128


def _round_up(v, m):
    return (v + m - 1) // m * m


def _pad_to(x, shape):
    pads = [(0, s - d) for d, s in zip(x.shape, shape)]
    return jnp.pad(x, pads)


def sage_conv_kernel(a_ref, x_ref, wl_ref, wr_ref, b_ref, out_ref,
                     agg_ref, acc_ref, *, apply_relu):
    """Grid point (i, k): target-row tile i, source-node tile k.

    a_ref  : (TM, TM)          bf16 row-normalized adjacency tile A[i-tile, k-tile]
    x_ref  : (TM, Cin_pad)     bf16 features of source tile k
    wl_ref : (Cin_pad, Cout_pad) bf16 lin_l weight (pre-transposed, zero-padded)
    wr_ref : (Cin_pad, Cout_pad) bf16 lin_r weight (pre-transposed, zero-padded)
    b_ref  : (1, Cout_pad)     f32 lin_l bias (zero-padded)
    out_ref: (TM, Cout_pad)    bf16 output tile (resident across the k axis)
    agg_ref: (TM, Cin_pad)     f32 scratch — accumulated neighbor mean
    acc_ref: (TM, Cout_pad)    f32 scratch — root (self) term
    """
    i = pl.program_id(0)
    k = pl.program_id(1)

    @pl.when(k == 0)
    def _():
        agg_ref[...] = jnp.zeros_like(agg_ref)
        acc_ref[...] = jnp.zeros_like(acc_ref)

    # Partial neighbor-mean aggregation on the MXU: bf16 operands, f32 accumulation.
    agg_ref[...] += jnp.dot(a_ref[...], x_ref[...],
                            preferred_element_type=jnp.float32)

    # Since tm == tk, the source tile with k == i holds exactly this tile's own rows:
    # fold in the root/self term x_self @ Wr here (no separate self-feature stream).
    @pl.when(k == i)
    def _():
        acc_ref[...] += jnp.dot(x_ref[...], wr_ref[...],
                                preferred_element_type=jnp.float32)

    @pl.when(k == pl.num_programs(1) - 1)
    def _():
        out = jnp.dot(agg_ref[...].astype(jnp.bfloat16), wl_ref[...],
                      preferred_element_type=jnp.float32)
        out = out + acc_ref[...] + b_ref[...]
        if apply_relu:
            out = jnp.maximum(out, 0.0)
        out_ref[...] = out.astype(out_ref.dtype)


def sage_conv(adj, x, wl, wr, b, *, apply_relu, tm=128):
    """One SAGEConv layer via pallas_call.

    adj : (Np, Np) bf16 row-normalized adjacency (rows = targets, cols = sources)
    x   : (Np, Cin_pad) bf16 node features
    wl  : (Cin_pad, Cout_pad) bf16, wr: same, b: (1, Cout_pad) f32.
    Np % tm == 0, Cin_pad/Cout_pad multiples of 128.
    """
    n, cin = x.shape
    cout = wl.shape[1]
    assert n % tm == 0 and cin % LANE == 0 and cout % LANE == 0
    grid = (n // tm, n // tm)
    kernel = functools.partial(sage_conv_kernel, apply_relu=apply_relu)
    return pl.pallas_call(
        kernel,
        out_shape=jax.ShapeDtypeStruct((n, cout), jnp.bfloat16),
        grid=grid,
        in_specs=[
            pl.BlockSpec((tm, tm), lambda i, k: (i, k)),       # adjacency tile
            pl.BlockSpec((tm, cin), lambda i, k: (k, 0)),      # source-node features
            pl.BlockSpec((cin, cout), lambda i, k: (0, 0)),    # Wl^T
            pl.BlockSpec((cin, cout), lambda i, k: (0, 0)),    # Wr^T
            pl.BlockSpec((1, cout), lambda i, k: (0, 0)),      # bias
        ],
        out_specs=pl.BlockSpec((tm, cout), lambda i, k: (i, 0)),
        scratch_shapes=[
            pltpu.VMEM((tm, cin), jnp.float32),   # neighbor-mean accumulator
            pltpu.VMEM((tm, cout), jnp.float32),  # self-term accumulator
        ],
        compiler_params=pltpu.CompilerParams(
            dimension_semantics=("parallel", "arbitrary"),
            vmem_limit_bytes=48 * 1024 * 1024,
        ),
    )(adj, x, wl, wr, b)


def make_sage_params(key, in_channels, hidden_channels, out_channels, num_layers):
    """Deterministic synthetic parameters matching SAGE.__init__ layer shapes."""
    dims = [in_channels] + [hidden_channels] * (num_layers - 1) + [out_channels]
    params = []
    for layer in range(num_layers):
        cin, cout = dims[layer], dims[layer + 1]
        key, k_wl, k_wr, k_b = jax.random.split(key, 4)
        scale = 1.0 / jnp.sqrt(jnp.float32(cin))
        wl = jax.random.normal(k_wl, (cin, cout), jnp.float32) * scale  # lin_l weight^T
        wr = jax.random.normal(k_wr, (cin, cout), jnp.float32) * scale  # lin_r weight^T
        b = jax.random.normal(k_b, (1, cout), jnp.float32) * scale      # lin_l bias
        params.append((wl, wr, b))
    return params


def build_norm_adjacency(edge_index, num_nodes):
    """Dense row-normalized adjacency for mean aggregation: A[i, j] = 1/deg_in(i)."""
    src, dst = edge_index[0], edge_index[1]
    a = jnp.zeros((num_nodes, num_nodes), jnp.float32).at[dst, src].add(1.0)
    deg = a.sum(axis=1, keepdims=True)
    return a / jnp.maximum(deg, 1.0)   # normalize in f32, cast to bf16 later


def sage_forward(x, adj, params, out_channels, *, tm=128):
    """SAGE.forward: conv -> relu (+ dropout, eval-mode identity) except last layer."""
    n, cin = x.shape
    n_pad = _round_up(n, tm)

    # Pad rows to a multiple of tm and channels to a multiple of 128 (lane-dense);
    # cast matmul operands to bf16 (accumulation stays f32 inside the kernel).
    adj_p = _pad_to(adj, (n_pad, n_pad)).astype(jnp.bfloat16)
    x_p = _pad_to(x, (n_pad, _round_up(cin, LANE))).astype(jnp.bfloat16)

    num_layers = len(params)
    for idx, (wl, wr, b) in enumerate(params):
        cin_l, cout_l = wl.shape
        cin_pad = _round_up(cin_l, LANE)
        cout_pad = _round_up(cout_l, LANE)
        wl_p = _pad_to(wl, (cin_pad, cout_pad)).astype(jnp.bfloat16)
        wr_p = _pad_to(wr, (cin_pad, cout_pad)).astype(jnp.bfloat16)
        b_p = _pad_to(b, (1, cout_pad))  # bias stays f32
        x_p = sage_conv(adj_p, x_p, wl_p, wr_p, b_p,
                        apply_relu=(idx != num_layers - 1), tm=tm)
        # F.dropout(p=0.5) in eval mode is identity; see TODO(synk) at top.

    # Strip row / channel padding (padded weight columns & bias are zero, so the
    # padded output columns are exactly zero and never contaminate real channels).
    return x_p[:n, :out_channels].astype(jnp.float32)


if __name__ == "__main__":
    # Small synthetic graph consistent with the module's forward signature.
    num_nodes = 256
    num_edges = 1024
    in_channels, hidden_channels, out_channels, num_layers = 16, 32, 8, 3

    key = jax.random.PRNGKey(0)
    k_x, k_src, k_dst, k_params = jax.random.split(key, 4)

    x = jax.random.normal(k_x, (num_nodes, in_channels), jnp.float32)
    edge_index = jnp.stack([
        jax.random.randint(k_src, (num_edges,), 0, num_nodes),
        jax.random.randint(k_dst, (num_edges,), 0, num_nodes),
    ])  # (2, E): row 0 = source j, row 1 = target i

    adj = build_norm_adjacency(edge_index, num_nodes)
    params = make_sage_params(k_params, in_channels, hidden_channels,
                              out_channels, num_layers)

    out = sage_forward(x, adj, params, out_channels, tm=128)
    out = jax.block_until_ready(out)
    assert out.shape == (num_nodes, out_channels), out.shape
    print("KERNEL_OK")
</pallas_src>

<mosaic_0001>
module attributes {stable_mosaic.version = 11 : i64} {
  func.func @sage_conv_kernel(%arg0: i32, %arg1: i32, %arg2: memref<128x128xbf16, #tpu.memory_space<vmem>>, %arg3: memref<128x128xbf16, #tpu.memory_space<vmem>>, %arg4: memref<128x128xbf16, #tpu.memory_space<vmem>>, %arg5: memref<128x128xbf16, #tpu.memory_space<vmem>>, %arg6: memref<1x128xf32, #tpu.memory_space<vmem>>, %arg7: memref<128x128xbf16, #tpu.memory_space<vmem>>, %arg8: memref<128x128xf32, #tpu.memory_space<vmem>>, %arg9: memref<128x128xf32, #tpu.memory_space<vmem>>) attributes {dimension_semantics = [#tpu.dimension_semantics<parallel>, #tpu.dimension_semantics<arbitrary>], iteration_bounds = array<i64: 2, 2>, scalar_prefetch = 0 : i64, scratch_operands = 2 : i64, tpu.core_type = #tpu.core_type<tc>, window_params = [{transform_indices = @transform_0, window_bounds = array<i64: 128, 128>}, {transform_indices = @transform_1, window_bounds = array<i64: 128, 128>}, {pipeline_mode = #tpu.pipeline_mode<synchronous>, transform_indices = @transform_2, window_bounds = array<i64: 128, 128>}, {pipeline_mode = #tpu.pipeline_mode<synchronous>, transform_indices = @transform_3, window_bounds = array<i64: 128, 128>}, {pipeline_mode = #tpu.pipeline_mode<synchronous>, transform_indices = @transform_4, window_bounds = array<i64: 1, 128>}, {transform_indices = @transform_5, window_bounds = array<i64: 128, 128>}]} {
    %c0_i32 = arith.constant 0 : i32
    %0 = arith.cmpi eq, %arg1, %c0_i32 : i32
    %1 = arith.extui %0 : i1 to i32
    %c0_i32_0 = arith.constant 0 : i32
    %2 = arith.cmpi ne, %1, %c0_i32_0 : i32
    scf.if %2 {
      %cst_10 = arith.constant 0.000000e+00 : f32
      %15 = vector.broadcast %cst_10 : f32 to vector<128x128xf32>
      %c0_11 = arith.constant 0 : index
      %c0_12 = arith.constant 0 : index
      %16 = vector.load %arg8[%c0_11, %c0_12] : memref<128x128xf32, #tpu.memory_space<vmem>>, vector<128x128xf32>
      tpu.vector_store %arg8[%c0_11, %c0_12], %15 {strides = array<i32>} : memref<128x128xf32, #tpu.memory_space<vmem>>, vector<128x128xf32>,
      %cst_13 = arith.constant 0.000000e+00 : f32
      %17 = vector.broadcast %cst_13 : f32 to vector<128x128xf32>
      %c0_14 = arith.constant 0 : index
      %c0_15 = arith.constant 0 : index
      %18 = vector.load %arg9[%c0_14, %c0_15] : memref<128x128xf32, #tpu.memory_space<vmem>>, vector<128x128xf32>
      tpu.vector_store %arg9[%c0_14, %c0_15], %17 {strides = array<i32>} : memref<128x128xf32, #tpu.memory_space<vmem>>, vector<128x128xf32>,
    } else {
    }
    %c0 = arith.constant 0 : index
    %c0_1 = arith.constant 0 : index
    %3 = vector.load %arg8[%c0, %c0_1] : memref<128x128xf32, #tpu.memory_space<vmem>>, vector<128x128xf32>
    %c0_2 = arith.constant 0 : index
    %c0_3 = arith.constant 0 : index
    %4 = vector.load %arg2[%c0_2, %c0_3] : memref<128x128xbf16, #tpu.memory_space<vmem>>, vector<128x128xbf16>
    %c0_4 = arith.constant 0 : index
    %c0_5 = arith.constant 0 : index
    %5 = vector.load %arg3[%c0_4, %c0_5] : memref<128x128xbf16, #tpu.memory_space<vmem>>, vector<128x128xbf16>
    %cst = arith.constant dense<0.000000e+00> : vector<128x128xf32>
    %6 = tpu.matmul %4, %5, %cst {dimension_numbers = #tpu.dot_dimension_numbers<[1], [0], [0], [1], [0, 0, 1, 1], [], []>} : vector<128x128xbf16>, vector<128x128xbf16>, vector<128x128xf32> -> vector<128x128xf32>
    %7 = arith.addf %3, %6 : vector<128x128xf32>
    %c0_6 = arith.constant 0 : index
    %c0_7 = arith.constant 0 : index
    %8 = vector.load %arg8[%c0_6, %c0_7] : memref<128x128xf32, #tpu.memory_space<vmem>>, vector<128x128xf32>
    tpu.vector_store %arg8[%c0_6, %c0_7], %7 {strides = array<i32>} : memref<128x128xf32, #tpu.memory_space<vmem>>, vector<128x128xf32>,
    %9 = arith.cmpi eq, %arg1, %arg0 : i32
    %10 = arith.extui %9 : i1 to i32
    %c0_i32_8 = arith.constant 0 : i32
    %11 = arith.cmpi ne, %10, %c0_i32_8 : i32
    scf.if %11 {
      %c0_10 = arith.constant 0 : index
      %c0_11 = arith.constant 0 : index
      %15 = vector.load %arg9[%c0_10, %c0_11] : memref<128x128xf32, #tpu.memory_space<vmem>>, vector<128x128xf32>
      %c0_12 = arith.constant 0 : index
      %c0_13 = arith.constant 0 : index
      %16 = vector.load %arg3[%c0_12, %c0_13] : memref<128x128xbf16, #tpu.memory_space<vmem>>, vector<128x128xbf16>
      %c0_14 = arith.constant 0 : index
      %c0_15 = arith.constant 0 : index
      %17 = vector.load %arg5[%c0_14, %c0_15] : memref<128x128xbf16, #tpu.memory_space<vmem>>, vector<128x128xbf16>
      %cst_16 = arith.constant dense<0.000000e+00> : vector<128x128xf32>
      %18 = tpu.matmul %16, %17, %cst_16 {dimension_numbers = #tpu.dot_dimension_numbers<[1], [0], [0], [1], [0, 0, 1, 1], [], []>} : vector<128x128xbf16>, vector<128x128xbf16>, vector<128x128xf32> -> vector<128x128xf32>
      %19 = arith.addf %15, %18 : vector<128x128xf32>
      %c0_17 = arith.constant 0 : index
      %c0_18 = arith.constant 0 : index
      %20 = vector.load %arg9[%c0_17, %c0_18] : memref<128x128xf32, #tpu.memory_space<vmem>>, vector<128x128xf32>
      tpu.vector_store %arg9[%c0_17, %c0_18], %19 {strides = array<i32>} : memref<128x128xf32, #tpu.memory_space<vmem>>, vector<128x128xf32>,
    } else {
    }
    %c1_i32 = arith.constant 1 : i32
    %12 = arith.cmpi eq, %arg1, %c1_i32 : i32
    %13 = arith.extui %12 : i1 to i32
    %c0_i32_9 = arith.constant 0 : i32
    %14 = arith.cmpi ne, %13, %c0_i32_9 : i32
    scf.if %14 {
      %c0_10 = arith.constant 0 : index
      %c0_11 = arith.constant 0 : index
      %15 = vector.load %arg8[%c0_10, %c0_11] : memref<128x128xf32, #tpu.memory_space<vmem>>, vector<128x128xf32>
      %16 = arith.truncf %15 : vector<128x128xf32> to vector<128x128xbf16>
      %c0_12 = arith.constant 0 : index
      %c0_13 = arith.constant 0 : index
      %17 = vector.load %arg4[%c0_12, %c0_13] : memref<128x128xbf16, #tpu.memory_space<vmem>>, vector<128x128xbf16>
      %cst_14 = arith.constant dense<0.000000e+00> : vector<128x128xf32>
      %18 = tpu.matmul %16, %17, %cst_14 {dimension_numbers = #tpu.dot_dimension_numbers<[1], [0], [0], [1], [0, 0, 1, 1], [], []>} : vector<128x128xbf16>, vector<128x128xbf16>, vector<128x128xf32> -> vector<128x128xf32>
      %c0_15 = arith.constant 0 : index
      %c0_16 = arith.constant 0 : index
      %19 = vector.load %arg9[%c0_15, %c0_16] : memref<128x128xf32, #tpu.memory_space<vmem>>, vector<128x128xf32>
      %20 = arith.addf %18, %19 : vector<128x128xf32>
      %c0_17 = arith.constant 0 : index
      %c0_18 = arith.constant 0 : index
      %21 = vector.load %arg6[%c0_17, %c0_18] : memref<1x128xf32, #tpu.memory_space<vmem>>, vector<1x128xf32>
      %22 = vector.broadcast %21 : vector<1x128xf32> to vector<128x128xf32>
      %23 = arith.addf %20, %22 : vector<128x128xf32>
      %cst_19 = arith.constant 0.000000e+00 : f32
      %24 = vector.broadcast %cst_19 : f32 to vector<128x128xf32>
      %25 = arith.maximumf %23, %24 : vector<128x128xf32>
      %26 = arith.truncf %25 : vector<128x128xf32> to vector<128x128xbf16>
      %c0_20 = arith.constant 0 : index
      %c0_21 = arith.constant 0 : index
      %27 = vector.load %arg7[%c0_20, %c0_21] : memref<128x128xbf16, #tpu.memory_space<vmem>>, vector<128x128xbf16>
      tpu.vector_store %arg7[%c0_20, %c0_21], %26 {strides = array<i32>} : memref<128x128xbf16, #tpu.memory_space<vmem>>, vector<128x128xbf16>,
    } else {
    }
    return
  }
  func.func @transform_0(%arg0: i32, %arg1: i32) -> (i32, i32) {
    %c0_i32 = arith.constant 0 : i32
    return %arg0, %arg1 : i32, i32
  }
  func.func @transform_1(%arg0: i32, %arg1: i32) -> (i32, i32) {
    %c0_i32 = arith.constant 0 : i32
    %c0_i32_0 = arith.constant 0 : i32
    return %arg1, %c0_i32 : i32, i32
  }
  func.func @transform_2(%arg0: i32, %arg1: i32) -> (i32, i32) {
    %c0_i32 = arith.constant 0 : i32
    %c0_i32_0 = arith.constant 0 : i32
    %c0_i32_1 = arith.constant 0 : i32
    return %c0_i32, %c0_i32_0 : i32, i32
  }
  func.func @transform_3(%arg0: i32, %arg1: i32) -> (i32, i32) {
    %c0_i32 = arith.constant 0 : i32
    %c0_i32_0 = arith.constant 0 : i32
    %c0_i32_1 = arith.constant 0 : i32
    return %c0_i32, %c0_i32_0 : i32, i32
  }
  func.func @transform_4(%arg0: i32, %arg1: i32) -> (i32, i32) {
    %c0_i32 = arith.constant 0 : i32
    %c0_i32_0 = arith.constant 0 : i32
    %c0_i32_1 = arith.constant 0 : i32
    return %c0_i32, %c0_i32_0 : i32, i32
  }
  func.func @transform_5(%arg0: i32, %arg1: i32) -> (i32, i32) {
    %c0_i32 = arith.constant 0 : i32
    %c0_i32_0 = arith.constant 0 : i32
    return %arg0, %c0_i32 : i32, i32
  }
}

</mosaic_0001>

<bundles_post_ra>
// kernel: tpu_custom_call.1
= control target key start
LH: loop header
LB: loop body
LE: loop exit
PB: predicated region body
PF: predicated region fallthrough
CT: control target
= control target key end

     0   :  { %s2722_s0 = inlined_call_operand.hbm [shape: bf16[256,256], index: 0, kind: input, shape index: {}]   ;;  %s2723_s1 = inlined_call_operand.hbm [shape: bf16[256,128], index: 1, kind: input, shape index: {}]   ;;  %s2724_s2 = inlined_call_operand.hbm [shape: bf16[128,128], index: 2, kind: input, shape index: {}]   ;;  %s2725_s3 = inlined_call_operand.hbm [shape: bf16[128,128], index: 3, kind: input, shape index: {}]   ;;  %s2726_s4 = inlined_call_operand.vmem [shape: f32[1,128], index: 4, kind: input, shape index: {}]   ;;  %s2727_s5 = inlined_call_operand.hbm [shape: bf16[256,128], index: 5, kind: output, shape index: {}]  }
   0x1   :  { %2751 = sst [smem:[#allocation27_spill]] %s2724_s2 }
   0x2   :  { %2752 = sst [smem:[#allocation28_spill]] %s2725_s3 }
   0x3   :  { %2753 = sst [smem:[#allocation29_spill]] %s2726_s4 }
   0x4   :  { %2754 = sst [smem:[#allocation30_spill]] %s2727_s5 }
   0x5   :  { %10 = vsyncpa [#allocation5], 0 }
   0x6   :  { %12 = vsyncpa [#allocation5 + $0x1], 0 }
   0x7   :  { %13 = vsyncpa [#allocation8], 0 }
   0x8   :  { %15 = vsyncpa [#allocation8 + $0x1], 0 }
   0x9   :  { %16 = vsyncpa [#allocation11], 0 }
   0xa   :  { %17 = vsyncpa [#allocation6], 0 }
   0xb   :  { %19 = vsyncpa [#allocation6 + $0x1], 0  ;;  %s2241_s18 = smov 0   ;;  %s2243_s19 = smov 0  }
   0xc   :  { %s2245_s20 = smov 0   ;;  %s2247_s21 = smov 0  }
   0xd   :  { %s2249_s22 = smov 0   ;;  %s2251_s23 = smov 0  }
   0xe   :  { %s2253_s24 = smov 0   ;;  %s2255_s25 = smov 0  }
   0xf   :  { %s2257_s26 = smov 0   ;;  %s2259_s27 = smov 0  }
  0x10   :  { %s2261_s28 = smov 0   ;;  %s2263_s29 = smov 0  }
  0x11   :  { %s2265_s30 = smov 0   ;;  %s2267_s6 = smov 0  }
  0x12 LB: > { %2755 = sst [smem:[#allocation18_spill]] %s2146_s18  ;;  %s2308_s7 = sadd.s32 4294967295, %s2198_s6   ;;  %s2198_s6 = sphi %s2267_s6, %s25_s6   ;;  %s2194_s30 = sphi %s2265_s30, %s2819_s30   ;;  %s2190_s29 = sphi %s2263_s29, %s2818_s29   ;;  %s2186_s28 = sphi %s2261_s28, %s2817_s28   ;;  %s2182_s27 = sphi %s2259_s27, %s2816_s27   ;;  %s2178_s26 = sphi %s2257_s26, %s2815_s26   ;;  %s2174_s25 = sphi %s2255_s25, %s2814_s25   ;;  %s2170_s24 = sphi %s2253_s24, %s2813_s24   ;;  %s2166_s23 = sphi %s2251_s23, %s2812_s23   ;;  %s2162_s22 = sphi %s2249_s22, %s2811_s22   ;;  %s2158_s21 = sphi %s2247_s21, %s2810_s21   ;;  %s2154_s20 = sphi %s2245_s20, %s2809_s20   ;;  %s2150_s19 = sphi %s2243_s19, %s2808_s19   ;;  %s2146_s18 = sphi %s2241_s18, %s2807_s18  }
  0x13   : > { %2756 = sst [smem:[#allocation19_spill]] %s2150_s19  ;;  %s1385_s8 = sadd.s32 4294967294, %s2198_s6  }
  0x14   : > { %2757 = sst [smem:[#allocation20_spill]] %s2182_s27  ;;  %p59_p0 = scmp.ne.s32.totalorder %s2174_s25, %s2170_s24 }
  0x15   : > { %2758 = sst [smem:[#allocation21_spill]] %s2186_s28  ;;  %p2733_p1 = scmp.eq.s32.totalorder %s2308_s7, 0 }
  0x16   : > { %2759 = sst [smem:[#allocation22_spill]] %s2308_s7  ;;  %p85_p2 = scmp.ne.s32.totalorder %s2162_s22, %s2158_s21 }
  0x17   : > { %p2317_p3 = por %p2733_p1, %p59_p0  ;;  %p171_p4 = scmp.ne.s32.totalorder %s2154_s20, %s2150_s19 }
  0x18   : > { %p2325_p5 = por %p85_p2, %p2733_p1  ;;  %p172_p6 = scmp.eq.s32.totalorder %s2308_s7, 3 }
  0x19   : > { %s2760_s10 = scalar_select %p2317_p3, 1, 0 }
  0x1a   : > { %s2761_s11 = scalar_select %p2325_p5, 1, 0 }
  0x1b   : > { %p177_p7 = scmp.ne.s32.totalorder %s2150_s19, %s2146_s18  ;;  %p178_p8 = scmp.eq.s32.totalorder %s1385_s8, 3 }
  0x1c   : > { %2762 = sst [smem:[#allocation23_spill]] %s2761_s11  ;;  %p2332_p9 = por %p172_p6, %p171_p4 }
  0x1d   : > { %p1386_p10 = scmp.ge.s32.totalorder %s2198_s6, 1  ;;  %p2337_p11 = por %p178_p8, %p177_p7 }
  0x1e   : > { %s2763_s12 = scalar_select %p2332_p9, 1, 0 }
  0x1f   : > { %s2765_s13 = scalar_select %p2337_p11, 1, 0 }
  0x20   : > { %2764 = sst [smem:[#allocation24_spill]] %s2763_s12  ;;  %p185_p12 = scmp.lt.s32.totalorder %s2198_s6, 5 }
  0x21   : > { %2766 = sst [smem:[#allocation25_spill]] %s2765_s13  ;;  %s2200_s15 = smov [#allocation9]  }
  0x22   : > { %p2342_p13 = pnand %p1386_p10, %p185_p12  ;;  %s197_s16 = sshll.u32 %s2200_s15, 4  ;;  %s198_s16 = int_to_ptr.vmem [resolvable:$true] %s197_s16 }
  0x23   : > { %s2201_s21 = smov [#allocation10]   ;;  %s2769_s2 = sld [smem:[#allocation27_spill]] }
  0x24   : > { %s2767_s14 = scalar_select %p2342_p13, 1, 0 }
  0x25   : > { %p1740_p0 = pneg %p2342_p13  ;;  %s210_s24 = sshll.u32 %s2201_s21, 4  ;;  %s2354_s24 = int_to_ptr.vmem [resolvable:$true] %s210_s24 }
  0x27   : > { %p2350_p2 = pnand %p1740_p0, %p2733_p1 }
  0x29   : > { %s1924_s13 = scalar_lea.hbm %s2769_s2, 1024  ;;  %p1926_p6 = pneg %p2350_p2 }
  0x2a   : > { %p1925_p4 = scmp.ne.s32.totalorder %s2769_s2, %s1924_s13  ;;  %p1931_p10 = scmp.lt.u32.totalorder %s1924_s13, %s2769_s2 }
  0x2c   : > { %p1927_p7 = pnand %p1926_p6, %p1925_p4 }
  0x2e   : > { %p1928_p8 = pneg %p1927_p7 }
  0x30   : > { %p1933_p12 = pnand %p1931_p10, %p1928_p8 }
  0x32   : > { %1936 = shalt.err (!%p1933_p12)
}
  0x33   : > { %s1937_s21 = scalar_lea.vmem %s198_s16, 1024  ;;  %p1945_p9 = scmp.lt.s32.totalorder %s198_s16, %s198_s16 }
  0x34   : > { %p1938_p0 = scmp.ne.s32.totalorder %s198_s16, %s1937_s21  ;;  %p1946_p5 = scmp.lt.s32.totalorder %s1937_s21, %s1937_s21 }
  0x36   : > { %p1940_p1 = pnand %p1938_p0, %p1926_p6  ;;  %p1947_p3 = por %p1946_p5, %p1945_p9 }
  0x38   : > { %p1941_p11 = pneg %p1940_p1 }
  0x3a   : > { %p1948_p13 = pnand %p1947_p3, %p1941_p11 }
  0x3c   : > { %1951 = shalt.err (!%p1948_p13)
}
  0x3d   : > { %s2738_s18 = smov 64   ;;  %s2740_s9 = smov 4  }
  0x3e   : > { %1743 = dma.hbm_to_vmem [thread:$0]  (!%p2350_p2), %s2769_s2, 1024, %s198_s16, [#allocation8], %s2738_s18, %s2738_s18, %s2740_s9  }
  0x3f   : > { %s2770_s3 = sld [smem:[#allocation28_spill]] }
  0x45   : > { %s1952_s15 = scalar_lea.hbm %s2770_s3, 1024 }
  0x46   : > { %p1953_p1 = scmp.ne.s32.totalorder %s2770_s3, %s1952_s15  ;;  %p1959_p9 = scmp.lt.u32.totalorder %s1952_s15, %s2770_s3 }
  0x48   : > { %p1955_p3 = pnand %p1953_p1, %p1926_p6 }
  0x4a   : > { %p1956_p5 = pneg %p1955_p3 }
  0x4c   : > { %p1961_p11 = pnand %p1959_p9, %p1956_p5 }
  0x4e   : > { %1964 = shalt.err (!%p1961_p11)
}
  0x4f   : > { %s1965_s16 = scalar_lea.vmem %s2354_s24, 1024  ;;  %p1973_p8 = scmp.lt.s32.totalorder %s2354_s24, %s2354_s24 }
  0x50   : > { %p1966_p13 = scmp.ne.s32.totalorder %s2354_s24, %s1965_s16  ;;  %p1974_p10 = scmp.lt.s32.totalorder %s1965_s16, %s1965_s16 }
  0x52   : > { %p1968_p4 = pnand %p1966_p13, %p1926_p6  ;;  %p1975_p12 = por %p1974_p10, %p1973_p8 }
  0x54   : > { %p1969_p7 = pneg %p1968_p4 }
  0x56   : > { %p1976_p0 = pnand %p1975_p12, %p1969_p7 }
  0x58   : > { %1979 = shalt.err (!%p1976_p0)
}
  0x59   : > { %1746 = dma.hbm_to_vmem [thread:$0]  (!%p2350_p2), %s2770_s3, 1024, %s2354_s24, [#allocation11], %s2738_s18, %s2738_s18, %s2740_s9  }
  0x5a   : > { %s34_s28 = sadd.s32 1, %s2190_s29  ;;  %s37_s17 = sadd.s32 1, %s2194_s30 }
  0x5b   : > { %p35_p6 = scmp.ge.s32.totalorder %s34_s28, 2  ;;  %s46_s5 = sadd.s32 1, %s2178_s26 }
  0x5c   : > { %p53_p1 = scmp.ne.s32.totalorder %s2178_s26, %s2174_s25  ;;  %p2750_p3 = scmp.eq.s32.totalorder %s2198_s6, 0 }
  0x5d   : > { %s2821_s28 = smov (%p35_p6, %s34_s28), 0  ;;  %s2823_s17 = smov (!%p35_p6, %s37_s17), %s2194_s30 }
  0x5e   : > { %2771 = sst [smem:[#allocation26_spill]] %s2821_s28  ;;  %s2420_s12 = ssub.s32 %s2190_s29, %s2821_s28 }
  0x5f   : > { %p2424_p2 = por %p2750_p3, %p53_p1  ;;  %p39_p5 = scmp.ge.s32.totalorder %s2823_s17, 2 }
  0x60   : > { %p70_p9 = scmp.eq.s32.totalorder %s2420_s12, 0  ;;  %p2749_p11 = scmp.lt.s32.totalorder %s2198_s6, 4 }
  0x61   : > { %s227_s13 = sand.u32 1, %s2178_s26   ;;  %s2825_s17 = smov (%p39_p5, %s2823_s17), 0 }
  0x62   : > { %s1390_s8 = sshll.u32 %s227_s13, 6  ;;  %s41_s15 = ssub.s32 %s2194_s30, %s2825_s17 }
  0x63   : > { %s43_s21 = sor.u32 %s2420_s12, %s41_s15  ;;  %p159_p13 = scmp.eq.s32.totalorder %s41_s15, 0 }
  0x64   : > { %p44_p4 = scmp.eq.s32.totalorder %s43_s21, 0  ;;  %s1468_s16 = sshll.u32 %s2194_s30, 5 }
  0x65   : > { %s2773_s4 = sadd.s32 1, %s2154_s20  ;;  %s237_s9 = sadd.s32 %s2190_s29, %s1468_s16 }
  0x66   : > { %s2440_s27 = scalar_select %p159_p13, %s2154_s20, %s2773_s4  }
  0x67   : > { %s2443_s18 = scalar_select %p44_p4, %s2178_s26, %s46_s5  }
  0x68   : > { %s231_s2 = scalar_lea.vmem [#allocation4], %s1390_s8  ;;  %s1393_s28 = sshll.u32 %s237_s9, 6 }
  0x69   : > { %s240_s3 = sshll.u32 %s231_s2, 4  ;;  %s2451_s7 = scalar_lea.hbm %s2722_s0, %s1393_s28  ;;  %s2446_s3 = int_to_ptr.vmem [resolvable:$true] %s240_s3 }
  0x6a   : > { %p2457_p7 = pnand %p2749_p11, %p2424_p2  ;;  %s2461_s2 = scalar_lea.sflag [#allocation5], %s227_s13 }
  0x6b   : > { %s1980_s9 = scalar_lea.hbm %s2451_s7, 1024  ;;  %s1985_s28 = scalar_lea.hbm %s2722_s0, 4096 }
  0x6c   : > { %p1981_p8 = scmp.ne.s32.totalorder %s2451_s7, %s1980_s9  ;;  %p1982_p10 = pneg %p2457_p7 }
  0x6d   : > { %p1986_p6 = scmp.lt.u32.totalorder %s2451_s7, %s2722_s0  ;;  %p1987_p1 = scmp.lt.u32.totalorder %s1985_s28, %s1980_s9 }
  0x6e   : > { %p1983_p12 = pnand %p1982_p10, %p1981_p8  ;;  %p1989_p5 = scmp.lt.u32.totalorder %s1980_s9, %s2451_s7 }
  0x6f   : > { %p1988_p2 = por %p1987_p1, %p1986_p6 }
  0x70   : > { %p1984_p0 = pneg %p1983_p12 }
  0x71   : > { %p1990_p13 = por %p1989_p5, %p1988_p2 }
  0x73   : > { %p1991_p4 = pnand %p1990_p13, %p1984_p0 }
  0x75   : > { %1994 = shalt.err (!%p1991_p4)
}
  0x76   : > { %s1995_s13 = scalar_lea.vmem %s2446_s3, 1024  ;;  %s2204_s15 = smov [#allocation4]  }
  0x77   : > { %p1996_p8 = scmp.ne.s32.totalorder %s2446_s3, %s1995_s13  ;;  %s2000_s21 = sshll.u32 %s2204_s15, 4  ;;  %s2001_s21 = int_to_ptr.vmem [resolvable:$false] %s2000_s21 }
  0x78   : > { %s2002_s16 = scalar_lea.vmem %s2001_s21, 2048  ;;  %p2003_p3 = scmp.lt.s32.totalorder %s2446_s3, %s2001_s21 }
  0x79   : > { %p1998_p12 = pnand %p1996_p8, %p1982_p10  ;;  %p2004_p6 = scmp.lt.s32.totalorder %s2002_s16, %s1995_s13 }
  0x7b   : > { %p1999_p11 = pneg %p1998_p12  ;;  %p2005_p1 = por %p2004_p6, %p2003_p3 }
  0x7d   : > { %p2006_p2 = pnand %p2005_p1, %p1999_p11 }
  0x7f   : > { %2009 = shalt.err (!%p2006_p2)
}
  0x80   : > { %s2205_s4 = smov 128   ;;  %s2775_s9 = smov 4  }
  0x81   : > { %s2776_s19 = smov 64   ;;  %s72_s11 = sadd.s32 1, %s2166_s23 }
  0x82   : > { %1750 = dma.hbm_to_vmem [thread:$0]  (!%p2457_p7), %s2451_s7, 1024, %s2446_s3, %s2461_s2, %s2205_s4, %s2776_s19, %s2775_s9  }
  0x83   : > { %p79_p3 = scmp.ne.s32.totalorder %s2166_s23, %s2162_s22  ;;  %p2777_p11 = scmp.eq.s32.totalorder %s2198_s6, 0 }
  0x84   : > { %s2497_s5 = scalar_select %p70_p9, %s2166_s23, %s72_s11  }
  0x85   : > { %p81_p10 = por %p79_p3, %p2777_p11  ;;  %s250_s28 = sand.u32 1, %s2198_s6  }
  0x86   : > { %s252_s24 = sand.u32 1, %s2166_s23   ;;  %s1469_s13 = sshll.u32 %s2190_s29, 10 }
  0x87   : > { %s1394_s8 = sshll.u32 %s252_s24, 6  ;;  %s2507_s16 = scalar_lea.hbm %s2723_s1, %s1469_s13 }
  0x88   : > { %s254_s3 = scalar_lea.vmem [#allocation7], %s1394_s8  ;;  %p2778_p7 = scmp.lt.s32.totalorder %s2198_s6, 4 }
  0x89   : > { %s261_s7 = sshll.u32 %s254_s3, 4  ;;  %s2517_s2 = scalar_lea.sflag [#allocation8], %s250_s28  ;;  %s2515_s7 = int_to_ptr.vmem [resolvable:$true] %s261_s7 }
  0x8a   : > { %p2511_p9 = pnand %p2778_p7, %p81_p10  ;;  %s2010_s4 = scalar_lea.hbm %s2507_s16, 1024 }
  0x8b   : > { %p2011_p0 = scmp.ne.s32.totalorder %s2507_s16, %s2010_s4  ;;  %s2015_s8 = scalar_lea.hbm %s2723_s1, 2048 }
  0x8c   : > { %p2012_p5 = pneg %p2511_p9  ;;  %p2016_p8 = scmp.lt.u32.totalorder %s2507_s16, %s2723_s1 }
  0x8d   : > { %p2017_p12 = scmp.lt.u32.totalorder %s2015_s8, %s2010_s4  ;;  %p2019_p1 = scmp.lt.u32.totalorder %s2010_s4, %s2507_s16 }
  0x8e   : > { %p2013_p13 = pnand %p2012_p5, %p2011_p0 }
  0x8f   : > { %p2018_p6 = por %p2017_p12, %p2016_p8 }
  0x90   : > { %p2014_p4 = pneg %p2013_p13 }
  0x91   : > { %p2020_p2 = por %p2019_p1, %p2018_p6 }
  0x93   : > { %p2021_p3 = pnand %p2020_p2, %p2014_p4 }
  0x95   : > { %2024 = shalt.err (!%p2021_p3)
}
  0x96   : > { %s2025_s28 = scalar_lea.vmem %s2515_s7, 1024  ;;  %s2206_s21 = smov [#allocation7]  }
  0x97   : > { %p2026_p11 = scmp.ne.s32.totalorder %s2515_s7, %s2025_s28  ;;  %s2030_s3 = sshll.u32 %s2206_s21, 4  ;;  %s2031_s3 = int_to_ptr.vmem [resolvable:$false] %s2030_s3 }
  0x98   : > { %s2032_s11 = scalar_lea.vmem %s2031_s3, 2048  ;;  %p2033_p0 = scmp.lt.s32.totalorder %s2515_s7, %s2031_s3 }
  0x99   : > { %p2028_p10 = pnand %p2026_p11, %p2012_p5  ;;  %p2034_p13 = scmp.lt.s32.totalorder %s2032_s11, %s2025_s28 }
  0x9b   : > { %p2029_p7 = pneg %p2028_p10  ;;  %p2035_p8 = por %p2034_p13, %p2033_p0 }
  0x9d   : > { %p2036_p12 = pnand %p2035_p8, %p2029_p7 }
  0x9f   : > { %2039 = shalt.err (!%p2036_p12)
}
  0xa0   : > { %1753 = dma.hbm_to_vmem [thread:$0]  (!%p2511_p9), %s2507_s16, 1024, %s2515_s7, %s2517_s2, %s2776_s19, %s2776_s19, %s2775_s9  }
  0xa1   : > { %p2780_p5 = scmp.ne.s32.totalorder %s2767_s14, 0 }
  0xa2   : > { %s275_s4 = sand.u32 (!%p2780_p5), 1, %s2174_s25   ;;  %p2781_p4 = scmp.ne.s32.totalorder (!%p2780_p5), %s2760_s10, 0 }
  0xa3   : > { %273 = sbr.rel (%p2780_p5) target bundleno = 985 (0x3d9), region = 40  ;;  %s1398_s24 = sshll.u32 (!%p2780_p5), %s275_s4, 6 }
  0xa4   : > { %s276_s8 = scalar_lea.sflag (!%p2780_p5), [#allocation5], %s275_s4  ;;  %s2551_s13 = scalar_lea.vmem (!%p2780_p5), [#allocation4], %s1398_s24 }
  0xaa   : > { %2125 = dma.done.wait (%p2781_p4), %s276_s8, 1024  }
  0xab   : > { %2127 = vsyncadd (%p2781_p4), %s276_s8, 4294966272  ;;  %s2782_s12 = sld [smem:[#allocation22_spill]]  ;;  %s2783_s15 = sld [smem:[#allocation23_spill]] }
  0xac   : > { %s286_s9 = sand.u32 1, %s2162_s22  }
  0xad   : > { %s1399_s19 = sshll.u32 %s286_s9, 6 }
  0xae   : > { %s2559_s16 = scalar_lea.vmem [#allocation7], %s1399_s19 }
  0xb1   : > { %s284_s28 = sand.u32 1, %s2782_s12   ;;  %p2784_p9 = scmp.ne.s32.totalorder %s2783_s15, 0 }
  0xb2   : > { %s285_s14 = scalar_lea.sflag [#allocation8], %s284_s28 }
  0xb3   : > { %2129 = dma.done.wait (%p2784_p9), %s285_s14, 1024  }
  0xb4   : > { %2131 = vsyncadd (%p2784_p9), %s285_s14, 4294966272  ;;  %p2785_p6 = scmp.eq.s32.totalorder %s2782_s12, 0 }
  0xb6   : > { %2133 = dma.done.wait (%p2785_p6), [#allocation8], 1024   ;;  %p2786_p1 = pmov %p2785_p6 }
  0xb8   : > { %2135 = vsyncadd (%p2786_p1), [#allocation8], 4294966272  ;;  %p2787_p2 = pmov %p2786_p1 }
  0xb9   : > { %p2788_p3 = pmov %p2786_p1 }
  0xba   : > { %2137 = dma.done.wait (%p2787_p2), [#allocation11], 1024  }
  0xbb   : > { %2139 = vsyncadd (%p2788_p3), [#allocation11], 4294966272  ;;  %s2789_s10 = sld [smem:[#allocation19_spill]]  ;;  %s2790_s3 = sld [smem:[#allocation20_spill]] }
  0xc1   : > { %s325_s7 = sand.u32 1, %s2789_s10   ;;  %p1403_p11 = scmp.ne.s32.totalorder %s2790_s3, 0 }
  0xc2   : > { %s1402_s2 = sshll.u32 %s325_s7, 6  ;;  %v2207_v0 = vmov (!%p1403_p11), 0.0  }
  0xc3   : > { %s2576_s21 = scalar_lea.vmem [#allocation12], %s1402_s2  ;;  %335 = sbr.rel (%p1403_p11) target bundleno = 211 (0xd3), region = 60  ;;  %336 = vst [vmem:[#allocation2] sm:$0xff] (!%p1403_p11), %v2207_v0  ;;  %337 = vst [vmem:[#allocation2 + $0x8] sm:$0xff] (!%p1403_p11), %v2207_v0 }
  0xc4   : > { %338 = vst [vmem:[#allocation2 + $0x10] sm:$0xff] (!%p1403_p11), %v2207_v0  ;;  %339 = vst [vmem:[#allocation2 + $0x18] sm:$0xff] (!%p1403_p11), %v2207_v0 }
  0xc5   : > { %340 = vst [vmem:[#allocation2 + $0x20] sm:$0xff] (!%p1403_p11), %v2207_v0  ;;  %341 = vst [vmem:[#allocation2 + $0x28] sm:$0xff] (!%p1403_p11), %v2207_v0 }
  0xc6   : > { %342 = vst [vmem:[#allocation2 + $0x30] sm:$0xff] (!%p1403_p11), %v2207_v0  ;;  %343 = vst [vmem:[#allocation2 + $0x38] sm:$0xff] (!%p1403_p11), %v2207_v0 }
  0xc7   : > { %344 = vst [vmem:[#allocation2 + $0x40] sm:$0xff] (!%p1403_p11), %v2207_v0  ;;  %345 = vst [vmem:[#allocation2 + $0x48] sm:$0xff] (!%p1403_p11), %v2207_v0 }
  0xc8   : > { %346 = vst [vmem:[#allocation2 + $0x50] sm:$0xff] (!%p1403_p11), %v2207_v0  ;;  %347 = vst [vmem:[#allocation2 + $0x58] sm:$0xff] (!%p1403_p11), %v2207_v0 }
  0xc9   : > { %348 = vst [vmem:[#allocation2 + $0x60] sm:$0xff] (!%p1403_p11), %v2207_v0  ;;  %349 = vst [vmem:[#allocation2 + $0x68] sm:$0xff] (!%p1403_p11), %v2207_v0 }
  0xca   : > { %350 = vst [vmem:[#allocation2 + $0x70] sm:$0xff] %v2207_v0  ;;  %351 = vst [vmem:[#allocation2 + $0x78] sm:$0xff] %v2207_v0 }
  0xcb   : > { %352 = vst [vmem:[#allocation3] sm:$0xff] %v2207_v0  ;;  %353 = vst [vmem:[#allocation3 + $0x8] sm:$0xff] %v2207_v0 }
  0xcc   : > { %354 = vst [vmem:[#allocation3 + $0x10] sm:$0xff] %v2207_v0  ;;  %355 = vst [vmem:[#allocation3 + $0x18] sm:$0xff] %v2207_v0 }
  0xcd   : > { %356 = vst [vmem:[#allocation3 + $0x20] sm:$0xff] %v2207_v0  ;;  %357 = vst [vmem:[#allocation3 + $0x28] sm:$0xff] %v2207_v0 }
  0xce   : > { %358 = vst [vmem:[#allocation3 + $0x30] sm:$0xff] %v2207_v0  ;;  %359 = vst [vmem:[#allocation3 + $0x38] sm:$0xff] %v2207_v0 }
  0xcf   : > { %360 = vst [vmem:[#allocation3 + $0x40] sm:$0xff] %v2207_v0  ;;  %361 = vst [vmem:[#allocation3 + $0x48] sm:$0xff] %v2207_v0 }
  0xd0   : > { %362 = vst [vmem:[#allocation3 + $0x50] sm:$0xff] %v2207_v0  ;;  %363 = vst [vmem:[#allocation3 + $0x58] sm:$0xff] %v2207_v0 }
  0xd1   : > { %364 = vst [vmem:[#allocation3 + $0x60] sm:$0xff] %v2207_v0  ;;  %365 = vst [vmem:[#allocation3 + $0x68] sm:$0xff] %v2207_v0 }
  0xd2   : > { %366 = vst [vmem:[#allocation3 + $0x70] sm:$0xff] %v2207_v0  ;;  %367 = vst [vmem:[#allocation3 + $0x78] sm:$0xff] %v2207_v0 }
  0xd3 PF: > { %v1884_v1 = vld [vmem:[%s2559_s16] sm:$0xff]   ;;  %v1885_v2 = vld [vmem:[%s2559_s16 + $0x8] sm:$0xff]   ;;  %v1886_v3 = vld [vmem:[%s2559_s16 + $0x10] sm:$0xff]   ;;  %s2791_s11 = sld [smem:[#allocation21_spill]]  ;;  %s2792_s4 = sld [smem:[#allocation20_spill]] }
  0xd4   : > { %1582 = vmatprep.subr.bf16.mxu0 %v1884_v1  ;;  %1678 = vmatprep.subr.bf16.mxu1 %v1884_v1  ;;  %v1887_v4 = vld [vmem:[%s2559_s16 + $0x18] sm:$0xff]   ;;  %v1892_v5 = vld [vmem:[%s2551_s13] sm:$0xff]   ;;  %v1889_v8 = vld [vmem:[%s2559_s16 + $0x28] sm:$0xff]  }
  0xd5   : > { %1583 = vmatpush3.bf16.msra.mxu0 %v1884_v1  ;;  %1686 = vmatpush3.bf16.msra.mxu1 %v1884_v1  ;;  %v1893_v6 = vld [vmem:[%s2551_s13 + $0x20] sm:$0xff]   ;;  %v1890_v9 = vld [vmem:[%s2559_s16 + $0x30] sm:$0xff]   ;;  %v1891_v10 = vld [vmem:[%s2559_s16 + $0x38] sm:$0xff]  }
  0xd6   : > { %1584 = vmatprep.subr.bf16.mxu0 %v1885_v2  ;;  %1679 = vmatprep.subr.bf16.mxu1 %v1885_v2  ;;  %v1888_v7 = vld [vmem:[%s2559_s16 + $0x20] sm:$0xff]   ;;  %v1894_v11 = vld [vmem:[%s2551_s13 + $0x8] sm:$0xff]   ;;  %v1896_v13 = vld [vmem:[%s2551_s13 + $0x10] sm:$0xff]  }
  0xd7   : > { %1598 = vmatprep.mubr.bf16.mxu0 %v1892_v5  ;;  %1606 = vmatprep.mubr.bf16.mxu1 %v1893_v6  ;;  %v1895_v12 = vld [vmem:[%s2551_s13 + $0x28] sm:$0xff]   ;;  %v1897_v14 = vld [vmem:[%s2551_s13 + $0x30] sm:$0xff]   ;;  %v1898_v15 = vld [vmem:[%s2551_s13 + $0x18] sm:$0xff]  }
  0xd8   : > { %v1899_v16 = vld [vmem:[%s2551_s13 + $0x38] sm:$0xff]   ;;  %v370_v17 = vld [vmem:[#allocation2 + $0x10] sm:$0xff]  ;;  %v368_v19 = vld [vmem:[#allocation2] sm:$0xff] }
  0xd9   : > { %1585 = vmatpush3.bf16.msra.mxu0 %v1885_v2  ;;  %1687 = vmatpush3.bf16.msra.mxu1 %v1885_v2  ;;  %v378_v18 = vld [vmem:[#allocation2 + $0x50] sm:$0xff]  ;;  %v376_v20 = vld [vmem:[#allocation2 + $0x40] sm:$0xff]  ;;  %v371_v23 = vld [vmem:[#allocation2 + $0x18] sm:$0xff]  ;;  %p1420_p10 = scmp.ne.s32.totalorder %s2792_s4, %s2791_s11 }
  0xda   : > { %1586 = vmatprep.subr.bf16.mxu0 %v1886_v3  ;;  %1680 = vmatprep.subr.bf16.mxu1 %v1886_v3  ;;  %v379_v24 = vld [vmem:[#allocation2 + $0x58] sm:$0xff]  ;;  %v369_v29 = vld [vmem:[#allocation2 + $0x8] sm:$0xff]  ;;  %v374_v41 = vld [vmem:[#allocation2 + $0x30] sm:$0xff] }
  0xdb   : > { %v377_v30 = vld [vmem:[#allocation2 + $0x48] sm:$0xff]  ;;  %v382_v42 = vld [vmem:[#allocation2 + $0x70] sm:$0xff]  ;;  %v372_v43 = vld [vmem:[#allocation2 + $0x20] sm:$0xff] }
  0xdc   : > { %v380_v44 = vld [vmem:[#allocation2 + $0x60] sm:$0xff]  ;;  %v375_v47 = vld [vmem:[#allocation2 + $0x38] sm:$0xff]  ;;  %v373_v53 = vld [vmem:[#allocation2 + $0x28] sm:$0xff] }
  0xdd   : > { %1587 = vmatpush3.bf16.msra.mxu0 %v1886_v3  ;;  %1688 = vmatpush3.bf16.msra.mxu1 %v1886_v3  ;;  %v383_v48 = vld [vmem:[#allocation2 + $0x78] sm:$0xff]  ;;  %v381_v54 = vld [vmem:[#allocation2 + $0x68] sm:$0xff]  ;;  %v1900_v1 = vld [vmem:[#allocation10] sm:$0xff] (!%p1420_p10)  }
  0xde   : > { %1588 = vmatprep.subr.bf16.mxu0 %v1887_v4  ;;  %1681 = vmatprep.subr.bf16.mxu1 %v1887_v4  ;;  %v1901_v2 = vld [vmem:[#allocation10 + $0x8] sm:$0xff] (!%p1420_p10)   ;;  %v1902_v3 = vld [vmem:[#allocation10 + $0x10] sm:$0xff] (!%p1420_p10)   ;;  %v1908_v5 = vld [vmem:[%s2559_s16] sm:$0xff] (!%p1420_p10)  }
  0xdf   : > { %v1909_v6 = vld [vmem:[%s2559_s16 + $0x20] sm:$0xff] (!%p1420_p10)  }
  0xe1   : > { %1589 = vmatpush3.bf16.msra.mxu0 %v1887_v4  ;;  %1689 = vmatpush3.bf16.msra.mxu1 %v1887_v4  ;;  %v1903_v4 = vld [vmem:[#allocation10 + $0x18] sm:$0xff] (!%p1420_p10)  }
  0xe2   : > { %1590 = vmatprep.subr.bf16.mxu0 %v1888_v7  ;;  %1682 = vmatprep.subr.bf16.mxu1 %v1888_v7 }
  0xe5   : > { %1591 = vmatpush3.bf16.msra.mxu0 %v1888_v7  ;;  %1690 = vmatpush3.bf16.msra.mxu1 %v1888_v7  ;;  %v1904_v7 = vld [vmem:[#allocation10 + $0x20] sm:$0xff] (!%p1420_p10)  }
  0xe6   : > { %1592 = vmatprep.subr.bf16.mxu0 %v1889_v8  ;;  %1683 = vmatprep.subr.bf16.mxu1 %v1889_v8 }
  0xe9   : > { %1593 = vmatpush3.bf16.msra.mxu0 %v1889_v8  ;;  %1691 = vmatpush3.bf16.msra.mxu1 %v1889_v8  ;;  %v1905_v8 = vld [vmem:[#allocation10 + $0x28] sm:$0xff] (!%p1420_p10)  }
  0xea   : > { %1594 = vmatprep.subr.bf16.mxu0 %v1890_v9  ;;  %1684 = vmatprep.subr.bf16.mxu1 %v1890_v9 }
  0xed   : > { %1595 = vmatpush3.bf16.msra.mxu0 %v1890_v9  ;;  %1692 = vmatpush3.bf16.msra.mxu1 %v1890_v9  ;;  %v1906_v9 = vld [vmem:[#allocation10 + $0x30] sm:$0xff] (!%p1420_p10)  }
  0xee   : > { %1596 = vmatprep.subr.bf16.mxu0 %v1891_v10  ;;  %1685 = vmatprep.subr.bf16.mxu1 %v1891_v10 }
  0xf1   : > { %1597 = vmatpush3.bf16.msra.mxu0 %v1891_v10  ;;  %1693 = vmatpush3.bf16.msra.mxu1 %v1891_v10  ;;  %v1907_v10 = vld [vmem:[#allocation10 + $0x38] sm:$0xff] (!%p1420_p10)  }
  0xf2   : > { %1614 = vmatprep.subr.bf16.mxu0 (!%p1420_p10), %v1900_v1  ;;  %1694 = vmatprep.subr.bf16.mxu1 (!%p1420_p10), %v1900_v1 }
  0xf4   : > { %1599 = vmatmul.mubr.bf16.vlgmr.msra.gmra.mrb[0].mxu0 %v1894_v11  ;;  %1607 = vmatmul.mubr.bf16.vlgmr.msra.gmra.mrb[0].mxu1 %v1895_v12  ;;  %v1910_v11 = vld [vmem:[%s2559_s16 + $0x8] sm:$0xff] (!%p1420_p10)  }
  0xf5   : > { %1602 = vmatprep.mubr.bf16.mxu0 %v1896_v13  ;;  %1610 = vmatprep.mubr.bf16.mxu1 %v1897_v14  ;;  %v1911_v12 = vld [vmem:[%s2559_s16 + $0x28] sm:$0xff] (!%p1420_p10)   ;;  %v1912_v13 = vld [vmem:[%s2559_s16 + $0x10] sm:$0xff] (!%p1420_p10)  }
  0xf6   : > { %1615 = vmatpush3.bf16.msra.mxu0 (!%p1420_p10), %v1900_v1  ;;  %1702 = vmatpush3.bf16.msra.mxu1 (!%p1420_p10), %v1900_v1  ;;  %v1913_v14 = vld [vmem:[%s2559_s16 + $0x30] sm:$0xff] (!%p1420_p10)  }
  0xf7   : > { %1616 = vmatprep.subr.bf16.mxu0 (!%p1420_p10), %v1901_v2  ;;  %1695 = vmatprep.subr.bf16.mxu1 (!%p1420_p10), %v1901_v2 }
  0xfa   : > { %1617 = vmatpush3.bf16.msra.mxu0 (!%p1420_p10), %v1901_v2  ;;  %1703 = vmatpush3.bf16.msra.mxu1 (!%p1420_p10), %v1901_v2 }
  0xfb   : > { %1618 = vmatprep.subr.bf16.mxu0 (!%p1420_p10), %v1902_v3  ;;  %1696 = vmatprep.subr.bf16.mxu1 (!%p1420_p10), %v1902_v3 }
  0xfc   : > { %1603 = vmatmul.mubr.bf16.gmra.mrb[4].mxu0 %v1898_v15  ;;  %1611 = vmatmul.mubr.bf16.gmra.mrb[4].mxu1 %v1899_v16  ;;  %v1914_v15 = vld [vmem:[%s2559_s16 + $0x18] sm:$0xff] (!%p1420_p10)  }
  0xfd   : > { %1630 = vmatprep.mubr.bf16.mxu0 (!%p1420_p10), %v1908_v5  ;;  %1638 = vmatprep.mubr.bf16.mxu1 (!%p1420_p10), %v1909_v6  ;;  %v1915_v16 = vld [vmem:[%s2559_s16 + $0x38] sm:$0xff] (!%p1420_p10)  }
  0xfe   : > { %1619 = vmatpush3.bf16.msra.mxu0 (!%p1420_p10), %v1902_v3  ;;  %1704 = vmatpush3.bf16.msra.mxu1 (!%p1420_p10), %v1902_v3 }
  0xff   : > { %1620 = vmatprep.subr.bf16.mxu0 (!%p1420_p10), %v1903_v4  ;;  %1697 = vmatprep.subr.bf16.mxu1 (!%p1420_p10), %v1903_v4 }
 0x102   : > { %1621 = vmatpush3.bf16.msra.mxu0 (!%p1420_p10), %v1903_v4  ;;  %1705 = vmatpush3.bf16.msra.mxu1 (!%p1420_p10), %v1903_v4 }
 0x103   : > { %1622 = vmatprep.subr.bf16.mxu0 (!%p1420_p10), %v1904_v7  ;;  %1698 = vmatprep.subr.bf16.mxu1 (!%p1420_p10), %v1904_v7 }
 0x106   : > { %1623 = vmatpush3.bf16.msra.mxu0 (!%p1420_p10), %v1904_v7  ;;  %1706 = vmatpush3.bf16.msra.mxu1 (!%p1420_p10), %v1904_v7 }
 0x107   : > { %1624 = vmatprep.subr.bf16.mxu0 (!%p1420_p10), %v1905_v8  ;;  %1699 = vmatprep.subr.bf16.mxu1 (!%p1420_p10), %v1905_v8 }
 0x10a   : > { %1625 = vmatpush3.bf16.msra.mxu0 (!%p1420_p10), %v1905_v8  ;;  %1707 = vmatpush3.bf16.msra.mxu1 (!%p1420_p10), %v1905_v8 }
 0x10b   : > { %1626 = vmatprep.subr.bf16.mxu0 (!%p1420_p10), %v1906_v9  ;;  %1700 = vmatprep.subr.bf16.mxu1 (!%p1420_p10), %v1906_v9 }
 0x10e   : > { %1627 = vmatpush3.bf16.msra.mxu0 (!%p1420_p10), %v1906_v9  ;;  %1708 = vmatpush3.bf16.msra.mxu1 (!%p1420_p10), %v1906_v9 }
 0x10f   : > { %1628 = vmatprep.subr.bf16.mxu0 (!%p1420_p10), %v1907_v10  ;;  %1701 = vmatprep.subr.bf16.mxu1 (!%p1420_p10), %v1907_v10 }
 0x112   : > { %1629 = vmatpush3.bf16.msra.mxu0 (!%p1420_p10), %v1907_v10  ;;  %1709 = vmatpush3.bf16.msra.mxu1 (!%p1420_p10), %v1907_v10 }
 0x1c7   : > { %v1600_v21 = vpop.f32.mrb[0].mxu0  ;;  %v1608_v22 = vpop.f32.mrb[0].mxu1 }
 0x1c8   : > { %v611_v25 = vadd.f32 %v1600_v21, %v370_v17  ;;  %v619_v26 = vadd.f32 %v1608_v22, %v378_v18  ;;  %v546_v27 = vpop.f32.mrb[1].mxu0  ;;  %v578_v28 = vpop.f32.mrb[1].mxu1  ;;  %v647_v17 = vld [vmem:[#allocation3 + $0x10] sm:$0xff] (!%p1420_p10) }
 0x1c9   : > { %v609_v31 = vadd.f32 %v546_v27, %v368_v19  ;;  %v617_v32 = vadd.f32 %v578_v28, %v376_v20  ;;  %v1601_v33 = vpop.f32.mrb[2].mxu0  ;;  %v1609_v34 = vpop.f32.mrb[2].mxu1  ;;  %v655_v18 = vld [vmem:[#allocation3 + $0x50] sm:$0xff] (!%p1420_p10)  ;;  %v645_v19 = vld [vmem:[#allocation3] sm:$0xff] (!%p1420_p10) }
 0x1ca   : > { %627 = vst [vmem:[#allocation2 + $0x10] sm:$0xff] %v611_v25  ;;  %635 = vst [vmem:[#allocation2 + $0x50] sm:$0xff] %v619_v26  ;;  %v612_v35 = vadd.f32 %v1601_v33, %v371_v23  ;;  %v620_v36 = vadd.f32 %v1609_v34, %v379_v24  ;;  %v549_v37 = vpop.f32.mrb[3].mxu0  ;;  %v581_v38 = vpop.f32.mrb[3].mxu1  ;;  %1631 = vmatmul.mubr.bf16.vlgmr.msra.gmra.mrb[0].mxu0 (!%p1420_p10), %v1910_v11  ;;  %1639 = vmatmul.mubr.bf16.vlgmr.msra.gmra.mrb[0].mxu1 (!%p1420_p10), %v1911_v12  ;;  %v653_v20 = vld [vmem:[#allocation3 + $0x40] sm:$0xff] (!%p1420_p10)  ;;  %v648_v23 = vld [vmem:[#allocation3 + $0x18] sm:$0xff] (!%p1420_p10) }
 0x1cb   : > { %625 = vst [vmem:[#allocation2] sm:$0xff] %v609_v31  ;;  %633 = vst [vmem:[#allocation2 + $0x40] sm:$0xff] %v617_v32  ;;  %v610_v39 = vadd.f32 %v549_v37, %v369_v29  ;;  %v618_v40 = vadd.f32 %v581_v38, %v377_v30  ;;  %1634 = vmatprep.mubr.bf16.mxu0 (!%p1420_p10), %v1912_v13  ;;  %1642 = vmatprep.mubr.bf16.mxu1 (!%p1420_p10), %v1913_v14  ;;  %v656_v24 = vld [vmem:[#allocation3 + $0x58] sm:$0xff] (!%p1420_p10)  ;;  %v646_v29 = vld [vmem:[#allocation3 + $0x8] sm:$0xff] (!%p1420_p10) }
 0x1cc   : > { %628 = vst [vmem:[#allocation2 + $0x18] sm:$0xff] %v612_v35  ;;  %636 = vst [vmem:[#allocation2 + $0x58] sm:$0xff] %v620_v36  ;;  %v654_v30 = vld [vmem:[#allocation3 + $0x48] sm:$0xff] (!%p1420_p10) }
 0x1cd   : > { %626 = vst [vmem:[#allocation2 + $0x8] sm:$0xff] %v610_v39  ;;  %634 = vst [vmem:[#allocation2 + $0x48] sm:$0xff] %v618_v40 }
 0x1cf   : > { %v1604_v45 = vpop.f32.mrb[4].mxu0  ;;  %v1612_v46 = vpop.f32.mrb[4].mxu1  ;;  %644 = sbr.rel (%p1420_p10) target bundleno = 684 (0x2ac), region = 64 }
 0x1d0   : > { %v615_v49 = vadd.f32 %v1604_v45, %v374_v41  ;;  %v623_v50 = vadd.f32 %v1612_v46, %v382_v42  ;;  %v562_v51 = vpop.f32.mrb[5].mxu0  ;;  %v594_v52 = vpop.f32.mrb[5].mxu1  ;;  %v651_v41 = vld [vmem:[#allocation3 + $0x30] sm:$0xff] (!%p1420_p10) }
 0x1d1   : > { %v613_v55 = vadd.f32 %v562_v51, %v372_v43  ;;  %v621_v56 = vadd.f32 %v594_v52, %v380_v44  ;;  %v1605_v57 = vpop.f32.mrb[6].mxu0  ;;  %v1613_v58 = vpop.f32.mrb[6].mxu1  ;;  %v659_v42 = vld [vmem:[#allocation3 + $0x70] sm:$0xff] (!%p1420_p10)  ;;  %v649_v43 = vld [vmem:[#allocation3 + $0x20] sm:$0xff] (!%p1420_p10) }
 0x1d2   : > { %631 = vst [vmem:[#allocation2 + $0x30] sm:$0xff] %v615_v49  ;;  %639 = vst [vmem:[#allocation2 + $0x70] sm:$0xff] %v623_v50  ;;  %v616_v59 = vadd.f32 %v1605_v57, %v375_v47  ;;  %v624_v60 = vadd.f32 %v1613_v58, %v383_v48  ;;  %v565_v61 = vpop.f32.mrb[7].mxu0  ;;  %v597_v62 = vpop.f32.mrb[7].mxu1  ;;  %1635 = vmatmul.mubr.bf16.gmra.mrb[4].mxu0 (!%p1420_p10), %v1914_v15  ;;  %1643 = vmatmul.mubr.bf16.gmra.mrb[4].mxu1 (!%p1420_p10), %v1915_v16  ;;  %v657_v44 = vld [vmem:[#allocation3 + $0x60] sm:$0xff] (!%p1420_p10)  ;;  %v652_v47 = vld [vmem:[#allocation3 + $0x38] sm:$0xff] (!%p1420_p10) }
 0x1d3   : > { %629 = vst [vmem:[#allocation2 + $0x20] sm:$0xff] %v613_v55  ;;  %637 = vst [vmem:[#allocation2 + $0x60] sm:$0xff] %v621_v56  ;;  %v614_v63 = vadd.f32 %v565_v61, %v373_v53  ;;  %v622_v0 = vadd.f32 %v597_v62, %v381_v54  ;;  %v660_v48 = vld [vmem:[#allocation3 + $0x78] sm:$0xff] (!%p1420_p10)  ;;  %v650_v53 = vld [vmem:[#allocation3 + $0x28] sm:$0xff] (!%p1420_p10) }
 0x1d4   : > { %632 = vst [vmem:[#allocation2 + $0x38] sm:$0xff] %v616_v59  ;;  %640 = vst [vmem:[#allocation2 + $0x78] sm:$0xff] %v624_v60  ;;  %v658_v54 = vld [vmem:[#allocation3 + $0x68] sm:$0xff] (!%p1420_p10) }
 0x1d5   : > { %630 = vst [vmem:[#allocation2 + $0x28] sm:$0xff] %v614_v63  ;;  %638 = vst [vmem:[#allocation2 + $0x68] sm:$0xff] %v622_v0 }
 0x29d   : > { %v1632_v21 = vpop.f32.mrb[0].mxu0  ;;  %v1640_v22 = vpop.f32.mrb[0].mxu1 }
 0x29e   : > { %v888_v25 = vadd.f32 %v1632_v21, %v647_v17  ;;  %v896_v26 = vadd.f32 %v1640_v22, %v655_v18  ;;  %v823_v27 = vpop.f32.mrb[1].mxu0  ;;  %v855_v28 = vpop.f32.mrb[1].mxu1 }
 0x29f   : > { %v886_v31 = vadd.f32 %v823_v27, %v645_v19  ;;  %v894_v32 = vadd.f32 %v855_v28, %v653_v20  ;;  %v1633_v33 = vpop.f32.mrb[2].mxu0  ;;  %v1641_v34 = vpop.f32.mrb[2].mxu1 }
 0x2a0   : > { %904 = vst [vmem:[#allocation3 + $0x10] sm:$0xff] %v888_v25  ;;  %912 = vst [vmem:[#allocation3 + $0x50] sm:$0xff] %v896_v26  ;;  %v889_v35 = vadd.f32 %v1633_v33, %v648_v23  ;;  %v897_v36 = vadd.f32 %v1641_v34, %v656_v24  ;;  %v826_v37 = vpop.f32.mrb[3].mxu0  ;;  %v858_v38 = vpop.f32.mrb[3].mxu1 }
 0x2a1   : > { %902 = vst [vmem:[#allocation3] sm:$0xff] %v886_v31  ;;  %910 = vst [vmem:[#allocation3 + $0x40] sm:$0xff] %v894_v32  ;;  %v887_v39 = vadd.f32 %v826_v37, %v646_v29  ;;  %v895_v40 = vadd.f32 %v858_v38, %v654_v30 }
 0x2a2   : > { %905 = vst [vmem:[#allocation3 + $0x18] sm:$0xff] %v889_v35  ;;  %913 = vst [vmem:[#allocation3 + $0x58] sm:$0xff] %v897_v36 }
 0x2a3   : > { %903 = vst [vmem:[#allocation3 + $0x8] sm:$0xff] %v887_v39  ;;  %911 = vst [vmem:[#allocation3 + $0x48] sm:$0xff] %v895_v40 }
 0x2a5   : > { %v1636_v45 = vpop.f32.mrb[4].mxu0  ;;  %v1644_v46 = vpop.f32.mrb[4].mxu1 }
 0x2a6   : > { %v892_v49 = vadd.f32 %v1636_v45, %v651_v41  ;;  %v900_v50 = vadd.f32 %v1644_v46, %v659_v42  ;;  %v839_v51 = vpop.f32.mrb[5].mxu0  ;;  %v871_v52 = vpop.f32.mrb[5].mxu1 }
 0x2a7   : > { %v890_v55 = vadd.f32 %v839_v51, %v649_v43  ;;  %v898_v56 = vadd.f32 %v871_v52, %v657_v44  ;;  %v1637_v57 = vpop.f32.mrb[6].mxu0  ;;  %v1645_v58 = vpop.f32.mrb[6].mxu1 }
 0x2a8   : > { %908 = vst [vmem:[#allocation3 + $0x30] sm:$0xff] %v892_v49  ;;  %916 = vst [vmem:[#allocation3 + $0x70] sm:$0xff] %v900_v50  ;;  %v893_v59 = vadd.f32 %v1637_v57, %v652_v47  ;;  %v901_v60 = vadd.f32 %v1645_v58, %v660_v48  ;;  %v842_v61 = vpop.f32.mrb[7].mxu0  ;;  %v874_v62 = vpop.f32.mrb[7].mxu1 }
 0x2a9   : > { %906 = vst [vmem:[#allocation3 + $0x20] sm:$0xff] %v890_v55  ;;  %914 = vst [vmem:[#allocation3 + $0x60] sm:$0xff] %v898_v56  ;;  %v891_v63 = vadd.f32 %v842_v61, %v650_v53  ;;  %v899_v0 = vadd.f32 %v874_v62, %v658_v54 }
 0x2aa   : > { %909 = vst [vmem:[#allocation3 + $0x38] sm:$0xff] %v893_v59  ;;  %917 = vst [vmem:[#allocation3 + $0x78] sm:$0xff] %v901_v60 }
 0x2ab   : > { %907 = vst [vmem:[#allocation3 + $0x28] sm:$0xff] %v891_v63  ;;  %915 = vst [vmem:[#allocation3 + $0x68] sm:$0xff] %v899_v0 }
 0x2ac PF: > { %s2793_s24 = sld [smem:[#allocation20_spill]] }
 0x2b2   : > { %p1437_p7 = scmp.ne.s32.totalorder %s2793_s24, 1 }
 0x2b3   : > { %v1916_v1 = vld [vmem:[#allocation9] sm:$0xff] (!%p1437_p7)   ;;  %v1917_v2 = vld [vmem:[#allocation9 + $0x8] sm:$0xff] (!%p1437_p7)   ;;  %v1918_v3 = vld [vmem:[#allocation9 + $0x10] sm:$0xff] (!%p1437_p7)   ;;  %s2794_s12 = sld [smem:[#allocation29_spill]] (!%p1437_p7) }
 0x2b4   : > { %921 = sbr.rel (%p1437_p7) target bundleno = 957 (0x3bd), region = 68  ;;  %1646 = vmatprep.subr.bf16.mxu0 (!%p1437_p7), %v1916_v1  ;;  %1710 = vmatprep.subr.bf16.mxu1 (!%p1437_p7), %v1916_v1  ;;  %v1919_v4 = vld [vmem:[#allocation9 + $0x18] sm:$0xff] (!%p1437_p7)   ;;  %v922_v5 = vld [vmem:[#allocation2] sm:$0xff] (!%p1437_p7)  ;;  %v923_v6 = vld [vmem:[#allocation2 + $0x8] sm:$0xff] (!%p1437_p7) }
 0x2b5   : > { %1647 = vmatpush3.bf16.msra.mxu0 (!%p1437_p7), %v1916_v1  ;;  %1718 = vmatpush3.bf16.msra.mxu1 (!%p1437_p7), %v1916_v1  ;;  %v930_v7 = vld [vmem:[#allocation2 + $0x40] sm:$0xff] (!%p1437_p7)  ;;  %v938_v8 = vpack.c.bf16 (!%p1437_p7), %v923_v6, %v922_v5  ;;  %v931_v9 = vld [vmem:[#allocation2 + $0x48] sm:$0xff] (!%p1437_p7)  ;;  %v1922_v13 = vld [vmem:[#allocation9 + $0x30] sm:$0xff] (!%p1437_p7)  }
 0x2b6   : > { %1648 = vmatprep.subr.bf16.mxu0 (!%p1437_p7), %v1917_v2  ;;  %1711 = vmatprep.subr.bf16.mxu1 (!%p1437_p7), %v1917_v2  ;;  %v942_v10 = vpack.c.bf16 (!%p1437_p7), %v931_v9, %v930_v7  ;;  %v1920_v11 = vld [vmem:[#allocation9 + $0x20] sm:$0xff] (!%p1437_p7)   ;;  %v1921_v12 = vld [vmem:[#allocation9 + $0x28] sm:$0xff] (!%p1437_p7)   ;;  %v1923_v14 = vld [vmem:[#allocation9 + $0x38] sm:$0xff] (!%p1437_p7)  }
 0x2b7   : > { %1662 = vmatprep.mubr.bf16.mxu0 (!%p1437_p7), %v938_v8  ;;  %v924_v15 = vld [vmem:[#allocation2 + $0x10] sm:$0xff] (!%p1437_p7)  ;;  %v925_v16 = vld [vmem:[#allocation2 + $0x18] sm:$0xff] (!%p1437_p7)  ;;  %v926_v19 = vld [vmem:[#allocation2 + $0x20] sm:$0xff] (!%p1437_p7) }
 0x2b8   : > { %1670 = vmatprep.mubr.bf16.mxu1 (!%p1437_p7), %v942_v10  ;;  %v932_v17 = vld [vmem:[#allocation2 + $0x50] sm:$0xff] (!%p1437_p7)  ;;  %v933_v18 = vld [vmem:[#allocation2 + $0x58] sm:$0xff] (!%p1437_p7)  ;;  %v927_v20 = vld [vmem:[#allocation2 + $0x28] sm:$0xff] (!%p1437_p7)  ;;  %v939_v23 = vpack.c.bf16 (!%p1437_p7), %v925_v16, %v924_v15 }
 0x2b9   : > { %1649 = vmatpush3.bf16.msra.mxu0 (!%p1437_p7), %v1917_v2  ;;  %1719 = vmatpush3.bf16.msra.mxu1 (!%p1437_p7), %v1917_v2  ;;  %v934_v21 = vld [vmem:[#allocation2 + $0x60] sm:$0xff] (!%p1437_p7)  ;;  %v935_v22 = vld [vmem:[#allocation2 + $0x68] sm:$0xff] (!%p1437_p7)  ;;  %v943_v24 = vpack.c.bf16 (!%p1437_p7), %v933_v18, %v932_v17  ;;  %v940_v25 = vpack.c.bf16 (!%p1437_p7), %v927_v20, %v926_v19  ;;  %v928_v27 = vld [vmem:[#allocation2 + $0x30] sm:$0xff] (!%p1437_p7) }
 0x2ba   : > { %1650 = vmatprep.subr.bf16.mxu0 (!%p1437_p7), %v1918_v3  ;;  %1712 = vmatprep.subr.bf16.mxu1 (!%p1437_p7), %v1918_v3  ;;  %v944_v26 = vpack.c.bf16 (!%p1437_p7), %v935_v22, %v934_v21  ;;  %v929_v28 = vld [vmem:[#allocation2 + $0x38] sm:$0xff] (!%p1437_p7)  ;;  %v936_v29 = vld [vmem:[#allocation2 + $0x70] sm:$0xff] (!%p1437_p7)  ;;  %v962_v35 = vld [vmem:[#allocation3] sm:$0xff] (!%p1437_p7) }
 0x2bb   : > { %v937_v30 = vld [vmem:[#allocation2 + $0x78] sm:$0xff]  ;;  %v941_v31 = vpack.c.bf16 %v929_v28, %v928_v27  ;;  %v964_v33 = vld [vmem:[#allocation3 + $0x10] sm:$0xff]  ;;  %v970_v36 = vld [vmem:[#allocation3 + $0x40] sm:$0xff] }
 0x2bc   : > { %v945_v32 = vpack.c.bf16 %v937_v30, %v936_v29  ;;  %v972_v34 = vld [vmem:[#allocation3 + $0x50] sm:$0xff]  ;;  %v2609_v38 = vld [vmem:[%s2794_s12] ss:$0 sm:$0xff]  ;;  %v965_v40 = vld [vmem:[#allocation3 + $0x18] sm:$0xff] }
 0x2bd   : > { %1651 = vmatpush3.bf16.msra.mxu0 %v1918_v3  ;;  %1720 = vmatpush3.bf16.msra.mxu1 %v1918_v3  ;;  %v973_v41 = vld [vmem:[#allocation3 + $0x58] sm:$0xff]  ;;  %v963_v46 = vld [vmem:[#allocation3 + $0x8] sm:$0xff]  ;;  %v968_v0 = vld [vmem:[#allocation3 + $0x30] sm:$0xff] }
 0x2be   : > { %1652 = vmatprep.subr.bf16.mxu0 %v1919_v4  ;;  %1713 = vmatprep.subr.bf16.mxu1 %v1919_v4  ;;  %v971_v47 = vld [vmem:[#allocation3 + $0x48] sm:$0xff]  ;;  %v976_v3 = vld [vmem:[#allocation3 + $0x70] sm:$0xff]  ;;  %v974_v5 = vld [vmem:[#allocation3 + $0x60] sm:$0xff] }
 0x2bf   : > { %v969_v10 = vld [vmem:[#allocation3 + $0x38] sm:$0xff] }
 0x2c1   : > { %1653 = vmatpush3.bf16.msra.mxu0 %v1919_v4  ;;  %1721 = vmatpush3.bf16.msra.mxu1 %v1919_v4  ;;  %v966_v4 = vld [vmem:[#allocation3 + $0x20] sm:$0xff] }
 0x2c2   : > { %1654 = vmatprep.subr.bf16.mxu0 %v1920_v11  ;;  %1714 = vmatprep.subr.bf16.mxu1 %v1920_v11 }
 0x2c5   : > { %1655 = vmatpush3.bf16.msra.mxu0 %v1920_v11  ;;  %1722 = vmatpush3.bf16.msra.mxu1 %v1920_v11  ;;  %v977_v11 = vld [vmem:[#allocation3 + $0x78] sm:$0xff] }
 0x2c6   : > { %1656 = vmatprep.subr.bf16.mxu0 %v1921_v12  ;;  %1715 = vmatprep.subr.bf16.mxu1 %v1921_v12 }
 0x2c9   : > { %1657 = vmatpush3.bf16.msra.mxu0 %v1921_v12  ;;  %1723 = vmatpush3.bf16.msra.mxu1 %v1921_v12 }
 0x2ca   : > { %1658 = vmatprep.subr.bf16.mxu0 %v1922_v13  ;;  %1716 = vmatprep.subr.bf16.mxu1 %v1922_v13 }
 0x2cd   : > { %1659 = vmatpush3.bf16.msra.mxu0 %v1922_v13  ;;  %1724 = vmatpush3.bf16.msra.mxu1 %v1922_v13 }
 0x2ce   : > { %1660 = vmatprep.subr.bf16.mxu0 %v1923_v14  ;;  %1717 = vmatprep.subr.bf16.mxu1 %v1923_v14 }
 0x2d1   : > { %1661 = vmatpush3.bf16.msra.mxu0 %v1923_v14  ;;  %1725 = vmatpush3.bf16.msra.mxu1 %v1923_v14 }
 0x2d4   : > { %1663 = vmatmul.mubr.bf16.vlgmr.msra.gmra.mrb[0].mxu0 %v939_v23  ;;  %1671 = vmatmul.mubr.bf16.vlgmr.msra.gmra.mrb[0].mxu1 %v943_v24  ;;  %v967_v24 = vld [vmem:[#allocation3 + $0x28] sm:$0xff] }
 0x2d5   : > { %1666 = vmatprep.mubr.bf16.mxu0 %v940_v25  ;;  %1674 = vmatprep.mubr.bf16.mxu1 %v944_v26  ;;  %v975_v25 = vld [vmem:[#allocation3 + $0x68] sm:$0xff] }
 0x2dc   : > { %1667 = vmatmul.mubr.bf16.gmra.mrb[4].mxu0 %v941_v31  ;;  %1675 = vmatmul.mubr.bf16.gmra.mrb[4].mxu1 %v945_v32 }
 0x3a7   : > { %v1664_v37 = vpop.f32.mrb[0].mxu0  ;;  %v1672_v39 = vpop.f32.mrb[0].mxu1 }
 0x3a8   : > { %v1069_v42 = vadd.f32 %v1664_v37, %v964_v33  ;;  %v1101_v43 = vadd.f32 %v1672_v39, %v972_v34  ;;  %v1060_v44 = vpop.f32.mrb[1].mxu0  ;;  %v1092_v45 = vpop.f32.mrb[1].mxu1 }
 0x3a9   : > { %v1061_v48 = vadd.f32 %v1060_v44, %v962_v35  ;;  %v1093_v49 = vadd.f32 %v1092_v45, %v970_v36  ;;  %v1665_v50 = vpop.f32.mrb[2].mxu0  ;;  %v1673_v51 = vpop.f32.mrb[2].mxu1 }
 0x3aa   : > { %v1132_v52 = vadd.f32 %v2609_v38, %v1069_v42  ;;  %v1140_v53 = vadd.f32 %v2609_v38, %v1101_v43  ;;  %v1072_v54 = vadd.f32 %v1665_v50, %v965_v40  ;;  %v1104_v55 = vadd.f32 %v1673_v51, %v973_v41  ;;  %v1063_v56 = vpop.f32.mrb[3].mxu0  ;;  %v1095_v57 = vpop.f32.mrb[3].mxu1 }
 0x3ab   : > { %v1130_v58 = vadd.f32 %v2609_v38, %v1061_v48  ;;  %v1138_v59 = vadd.f32 %v2609_v38, %v1093_v49  ;;  %v1064_v60 = vadd.f32 %v1063_v56, %v963_v46  ;;  %v1096_v61 = vadd.f32 %v1095_v57, %v971_v47 }
 0x3ac   : > { %v1133_v62 = vadd.f32 %v2609_v38, %v1072_v54  ;;  %v1141_v63 = vadd.f32 %v2609_v38, %v1104_v55  ;;  %v1148_v6 = vmax.f32 %v1132_v52, 0.0  ;;  %v1156_v7 = vmax.f32 %v1140_v53, 0.0 }
 0x3ad   : > { %v1131_v1 = vadd.f32 %v2609_v38, %v1064_v60  ;;  %v1139_v2 = vadd.f32 %v2609_v38, %v1096_v61  ;;  %v1146_v12 = vmax.f32 %v1130_v58, 0.0  ;;  %v1154_v13 = vmax.f32 %v1138_v59, 0.0 }
 0x3ae   : > { %v1149_v8 = vmax.f32 %v1133_v62, 0.0  ;;  %v1157_v9 = vmax.f32 %v1141_v63, 0.0 }
 0x3af   : > { %v1147_v14 = vmax.f32 %v1131_v1, 0.0  ;;  %v1155_v15 = vmax.f32 %v1139_v2, 0.0  ;;  %v1668_v16 = vpop.f32.mrb[4].mxu0  ;;  %v1676_v17 = vpop.f32.mrb[4].mxu1 }
 0x3b0   : > { %v1495_v18 = vpack.c.bf16 %v1149_v8, %v1148_v6  ;;  %v1515_v19 = vpack.c.bf16 %v1157_v9, %v1156_v7  ;;  %v1085_v20 = vadd.f32 %v1668_v16, %v968_v0  ;;  %v1117_v21 = vadd.f32 %v1676_v17, %v976_v3  ;;  %v1076_v22 = vpop.f32.mrb[5].mxu0  ;;  %v1108_v23 = vpop.f32.mrb[5].mxu1 }
 0x3b1   : > { %v1490_v26 = vpack.c.bf16 %v1147_v14, %v1146_v12  ;;  %v1510_v27 = vpack.c.bf16 %v1155_v15, %v1154_v13  ;;  %v1077_v28 = vadd.f32 %v1076_v22, %v966_v4  ;;  %v1109_v29 = vadd.f32 %v1108_v23, %v974_v5  ;;  %v1669_v30 = vpop.f32.mrb[6].mxu0  ;;  %v1677_v31 = vpop.f32.mrb[6].mxu1 }
 0x3b2   : > { %1527 = vst [vmem:[%s2576_s21 + $0x8] sm:$0xff] %v1495_v18   ;;  %1531 = vst [vmem:[%s2576_s21 + $0x28] sm:$0xff] %v1515_v19   ;;  %v1136_v32 = vadd.f32 %v2609_v38, %v1085_v20  ;;  %v1144_v33 = vadd.f32 %v2609_v38, %v1117_v21  ;;  %v1088_v34 = vadd.f32 %v1669_v30, %v969_v10  ;;  %v1079_v36 = vpop.f32.mrb[7].mxu0  ;;  %v1111_v37 = vpop.f32.mrb[7].mxu1 }
 0x3b3   : > { %v1120_v35 = vadd.f32 %v1677_v31, %v977_v11  ;;  %1491 = vst [vmem:[%s2576_s21] sm:$0xff] %v1490_v26   ;;  %1530 = vst [vmem:[%s2576_s21 + $0x20] sm:$0xff] %v1510_v27   ;;  %v1134_v39 = vadd.f32 %v2609_v38, %v1077_v28  ;;  %v1142_v40 = vadd.f32 %v2609_v38, %v1109_v29 }
 0x3b4   : > { %v1080_v41 = vadd.f32 %v1079_v36, %v967_v24  ;;  %v1112_v42 = vadd.f32 %v1111_v37, %v975_v25  ;;  %v1137_v43 = vadd.f32 %v2609_v38, %v1088_v34  ;;  %v1152_v47 = vmax.f32 %v1136_v32, 0.0 }
 0x3b5   : > { %v1145_v44 = vadd.f32 %v2609_v38, %v1120_v35  ;;  %v1160_v48 = vmax.f32 %v1144_v33, 0.0  ;;  %v1150_v51 = vmax.f32 %v1134_v39, 0.0  ;;  %v1158_v52 = vmax.f32 %v1142_v40, 0.0 }
 0x3b6   : > { %v1135_v45 = vadd.f32 %v2609_v38, %v1080_v41  ;;  %v1143_v46 = vadd.f32 %v2609_v38, %v1112_v42  ;;  %v1153_v49 = vmax.f32 %v1137_v43, 0.0 }
 0x3b7   : > { %v1161_v50 = vmax.f32 %v1145_v44, 0.0 }
 0x3b8   : > { %v1151_v53 = vmax.f32 %v1135_v45, 0.0  ;;  %v1159_v54 = vmax.f32 %v1143_v46, 0.0  ;;  %v1505_v55 = vpack.c.bf16 %v1153_v49, %v1152_v47 }
 0x3b9   : > { %v1525_v56 = vpack.c.bf16 %v1161_v50, %v1160_v48 }
 0x3ba   : > { %v1500_v57 = vpack.c.bf16 %v1151_v53, %v1150_v51  ;;  %v1520_v58 = vpack.c.bf16 %v1159_v54, %v1158_v52  ;;  %1529 = vst [vmem:[%s2576_s21 + $0x18] sm:$0xff] %v1505_v55  }
 0x3bb   : > { %1533 = vst [vmem:[%s2576_s21 + $0x38] sm:$0xff] %v1525_v56  }
 0x3bc   : > { %1528 = vst [vmem:[%s2576_s21 + $0x10] sm:$0xff] %v1500_v57   ;;  %1532 = vst [vmem:[%s2576_s21 + $0x30] sm:$0xff] %v1520_v58  }
 0x3bd PF: > { %s2795_s15 = sld [smem:[#allocation21_spill]]  ;;  %s2797_s9 = sld [smem:[#allocation24_spill]] }
 0x3be   : > { %s2798_s10 = sld [smem:[#allocation30_spill]]  ;;  %s1256_s3 = sshll.u32 %s2576_s21, 4  ;;  %s2642_s3 = int_to_ptr.vmem [resolvable:$true] %s1256_s3 }
 0x3bf   : > { %s2646_s11 = scalar_lea.sflag [#allocation6], %s325_s7  ;;  %s2040_s4 = scalar_lea.vmem %s2642_s3, 1024 }
 0x3c0   : > { %p2041_p0 = scmp.ne.s32.totalorder %s2642_s3, %s2040_s4  ;;  %s2208_s24 = smov [#allocation12]  }
 0x3c1   : > { %s2044_s8 = sshll.u32 %s2208_s24, 4  ;;  %s2045_s8 = int_to_ptr.vmem [resolvable:$false] %s2044_s8 }
 0x3c2   : > { %s2046_s13 = scalar_lea.vmem %s2045_s8, 2048  ;;  %p2047_p5 = scmp.lt.s32.totalorder %s2642_s3, %s2045_s8 }
 0x3c3   : > { %s1486_s19 = sshll.u32 %s2795_s15, 10  ;;  %p2799_p13 = scmp.ne.s32.totalorder %s2797_s9, 0 }
 0x3c4   : > { %s2639_s2 = scalar_lea.hbm %s2798_s10, %s1486_s19  ;;  %p2048_p4 = scmp.lt.s32.totalorder %s2046_s13, %s2040_s4 }
 0x3c5   : > { %p2042_p8 = pnand %p2041_p0, %p2799_p13 }
 0x3c6   : > { %p2049_p9 = por %p2048_p4, %p2047_p5 }
 0x3c7   : > { %p2043_p12 = pneg %p2042_p8 }
 0x3c9   : > { %p2050_p6 = pnand %p2049_p9, %p2043_p12 }
 0x3cb   : > { %2053 = shalt.err (!%p2050_p6)
}
 0x3cc   : > { %s2054_s7 = scalar_lea.hbm %s2639_s2, 1024  ;;  %s2058_s15 = scalar_lea.hbm %s2798_s10, 2048 }
 0x3cd   : > { %p2055_p1 = scmp.ne.s32.totalorder %s2639_s2, %s2054_s7  ;;  %p2059_p11 = scmp.lt.u32.totalorder %s2639_s2, %s2798_s10 }
 0x3ce   : > { %p2060_p10 = scmp.lt.u32.totalorder %s2058_s15, %s2054_s7  ;;  %p2062_p0 = scmp.lt.u32.totalorder %s2054_s7, %s2639_s2 }
 0x3cf   : > { %p2056_p2 = pnand %p2055_p1, %p2799_p13 }
 0x3d0   : > { %p2061_p7 = por %p2060_p10, %p2059_p11 }
 0x3d1   : > { %p2057_p3 = pneg %p2056_p2 }
 0x3d2   : > { %p2063_p8 = por %p2062_p0, %p2061_p7 }
 0x3d4   : > { %p2064_p12 = pnand %p2063_p8, %p2057_p3 }
 0x3d6   : > { %2067 = shalt.err (!%p2064_p12)
}
 0x3d7   : > { %s2209_s14 = smov 64   ;;  %s2210_s16 = smov 4  }
 0x3d8   : > { %1738 = dma.vmem_to_hbm [thread:$0]  (%p2799_p13), %s2642_s3, 1024, %s2639_s2, %s2646_s11, %s2209_s14, %s2209_s14, %s2210_s16  }
 0x3d9 PF: > { %s2800_s4 = sld [smem:[#allocation18_spill]]  ;;  %s2801_s24 = sld [smem:[#allocation25_spill]] }
 0x3da   : > { %p1763_p5 = scmp.ge.s32.totalorder %s2198_s6, 2 }
 0x3df   : > { %s1271_s8 = sand.u32 1, %s2800_s4   ;;  %p2802_p4 = scmp.ne.s32.totalorder %s2801_s24, 0 }
 0x3e0   : > { %s1272_s13 = scalar_lea.sflag [#allocation6], %s1271_s8 }
 0x3e1   : > { %p1755_p9 = pnand %p1763_p5, %p2802_p4 }
 0x3e3   : > { %2141 = dma.done.wait (!%p1755_p9), %s1272_s13, 1024  }
 0x3e4   : > { %2143 = vsyncadd (!%p1755_p9), %s1272_s13, 4294966272  ;;  %s25_s6 = sadd.s32 1, %s2198_s6   ;;  %s2804_s21 = sld [smem:[#allocation19_spill]] }
 0x3e5   : > { %p2675_p6 = scmp.ge.s32.totalorder %s25_s6, 6   ;;  %s2805_s9 = smov %s2443_s18 }
 0x3e6   : > { %s2806_s2 = sld [smem:[#allocation26_spill]]  ;;  %s2808_s19 = smov %s2154_s20 }
 0x3e7   : > { %s2809_s20 = smov %s2440_s27  ;;  %s2813_s24 = smov %s2174_s25 }
 0x3e8   : > { %s2814_s25 = smov %s2178_s26  ;;  %s2815_s26 = smov %s2805_s9 }
 0x3e9   : > { %s2816_s27 = smov %s2190_s29  ;;  %s2817_s28 = smov %s2194_s30 }
 0x3ea   : > { %s2807_s18 = smov %s2804_s21  ;;  %s2810_s21 = smov %s2162_s22 }
 0x3eb   : > { %s2811_s22 = smov %s2166_s23  ;;  %s2812_s23 = smov %s2497_s5 }
 0x3ec   : > { %s2818_s29 = smov %s2806_s2  ;;  %s2819_s30 = smov %s2825_s17 }
 0x3ed   :  { %24 = sbr.rel (!%p2675_p6) target bundleno = 18 (0x12), region = 118 }
 0x3f4   :  { %1277 = vsyncpa [#allocation5], 1 }
 0x3f5   :  { %1279 = vsyncpa [#allocation5 + $0x1], 1 }
 0x3f6   :  { %1280 = vsyncpa [#allocation8], 1 }
 0x3f7   :  { %1282 = vsyncpa [#allocation8 + $0x1], 1 }
 0x3f8   :  { %1283 = vsyncpa [#allocation11], 1 }
 0x3f9   :  { %1284 = vsyncpa [#allocation6], 1 }
 0x3fa   :  { %1286 = vsyncpa [#allocation6 + $0x1], 1 }

</bundles_post_ra>
